<compile_context>
chip_gen: v7x
topology: tpu7x:2x2x1
jax: 0.10.0
libtpu: 0.0.40
codegen_flags: <defaults>
</compile_context>

<pallas_src>
import jax
import jax.numpy as jnp
from jax.experimental import pallas as pl
from jax.experimental.pallas import tpu as pltpu


def counter13_kernel(gp_ref, w_ref, b_ref, o_ref):
    g = gp_ref[0]                                    # (tile_b, L) compute dtype
    p = gp_ref[1]                                    # (tile_b, L) compute dtype
    # h = relu(g @ W + bias): MXU matmul with f32 accumulation + VPU bias/relu.
    h = jnp.dot(g, w_ref[...], preferred_element_type=jnp.float32)
    h = jnp.maximum(h + b_ref[...], 0.0)             # (tile_b, L) f32
    # Row-wise <h, p>: VPU multiply + lane reduction; no second MXU pass.
    r = jnp.sum(h * p.astype(jnp.float32), axis=-1, keepdims=True)  # (tile_b,1)
    # TODO(synk): F.dropout with training=True would need in-kernel PRNG
    # (pltpu.prng_seed + prng_random_bits); inference-mode identity here.
    # act_fun == ReLU, stored lane-dense as a (1, tile_b) row.
    o_ref[...] = jnp.maximum(r, 0.0).reshape(1, -1)


def _round_up(x, m):
    return ((x + m - 1) // m) * m


def counter13_forward_batched(pattern_embeddings, graph_embeddings, W, bias,
                              *, tile_b=512, compute_dtype=jnp.float32):
    """Batched Counter_13: B independent (pattern, graph) pairs sharing W.

    pattern_embeddings, graph_embeddings: (B, L) float arrays.
    Returns (B, 1) float32.
    """
    g_e = jnp.asarray(graph_embeddings, jnp.float32)
    p_e = jnp.asarray(pattern_embeddings, jnp.float32)
    assert g_e.shape == p_e.shape and g_e.ndim == 2
    B, L = g_e.shape
    W_c = jnp.asarray(W, jnp.float32).astype(compute_dtype)
    b = jnp.asarray(bias, jnp.float32).reshape(1, L)
    g_c = g_e.astype(compute_dtype)
    p_c = p_e.astype(compute_dtype)

    itemsize = jnp.dtype(compute_dtype).itemsize
    cost = pl.CostEstimate(
        flops=2 * B * L * L + 4 * B * L,
        transcendentals=0,
        bytes_accessed=2 * B * L * itemsize + L * L * itemsize + L * 4 + B * 4,
    )

    if B < 256:
        # Small batch: single shot, no grid / pipelining machinery; everything
        # (W <= 64 KiB + vectors) trivially fits in VMEM on all generations.
        # TODO(synk): at B == 1 launch + weight DMA dominate the ~32 KFLOP of
        # work; the only real lever is batching pairs through this entry.
        gp = jnp.stack([g_c, p_c], axis=0)           # (2, B, L): one operand
        out = pl.pallas_call(
            counter13_kernel,
            out_shape=jax.ShapeDtypeStruct((1, B), jnp.float32),
            in_specs=[pl.BlockSpec(memory_space=pltpu.MemorySpace.VMEM)] * 3,
            out_specs=pl.BlockSpec(memory_space=pltpu.MemorySpace.VMEM),
            cost_estimate=cost,
        )(gp, W_c, b)
        return out.reshape(B, 1)

    # Gridded path: tiles as large as allowed (<= tile_b) to amortize the
    # ~0.35 us per-step overhead, but always >= 2 tiles so the "parallel"
    # batch axis can be split across v7x's two TensorCores.
    tile_b = max(128, _round_up(tile_b, 128))
    tile_eff = min(tile_b, _round_up(pl.cdiv(B, 2), 128))
    B_pad = _round_up(B, tile_eff)
    if B_pad != B:
        pad = B_pad - B
        g_c = jnp.pad(g_c, ((0, pad), (0, 0)))       # zero rows -> output 0,
        p_c = jnp.pad(p_c, ((0, pad), (0, 0)))       # sliced off below
    gp = jnp.stack([g_c, p_c], axis=0)               # (2, B_pad, L): 1 DMA/step

    out = pl.pallas_call(
        counter13_kernel,
        out_shape=jax.ShapeDtypeStruct((1, B_pad), jnp.float32),
        grid=(B_pad // tile_eff,),
        in_specs=[
            pl.BlockSpec((2, tile_eff, L), lambda i: (0, i, 0)),  # g/p tile
            pl.BlockSpec((L, L), lambda i: (0, 0)),               # W, resident
            pl.BlockSpec((1, L), lambda i: (0, 0)),               # bias, resident
        ],
        out_specs=pl.BlockSpec((1, tile_eff), lambda i: (0, i)),  # lane-dense
        compiler_params=pltpu.CompilerParams(
            dimension_semantics=("parallel",),
        ),
        cost_estimate=cost,
    )(gp, W_c, b)
    return out[:, :B].reshape(B, 1)


def counter13_forward(pattern_embedding, graph_embedding, W, bias):
    """Single-pair forward matching Counter_13.forward; returns a scalar."""
    L = W.shape[0]
    out = counter13_forward_batched(
        jnp.asarray(pattern_embedding, jnp.float32).reshape(1, L),
        jnp.asarray(graph_embedding, jnp.float32).reshape(1, L),
        W, bias)
    return out.reshape(())   # torch.squeeze


def xavier_uniform(key, shape):
    fan_in, fan_out = shape[0], shape[1]
    limit = (6.0 / (fan_in + fan_out)) ** 0.5
    return jax.random.uniform(key, shape, jnp.float32, -limit, limit)


def _reference(p_e, g_e, W, bias):
    # Pure-JAX f32 reference of the batched forward.
    h = jnp.maximum(g_e @ W + bias, 0.0)             # (B, L)
    r = jnp.sum(h * p_e, axis=-1, keepdims=True)     # (B, 1) == h @ p_e row-wise
    return jnp.maximum(r, 0.0)


if __name__ == "__main__":
    L = 128  # 'length' hyperparameter of Counter_13

    key = jax.random.PRNGKey(0)
    k_w, k_b, k_p, k_g, k_pb, k_gb = jax.random.split(key, 6)

    # Deterministic parameter init (matching shapes from __init__).
    W_c_13 = xavier_uniform(k_w, (L, L))
    bias_c_13 = xavier_uniform(k_b, (1, L))

    # --- Single pattern/graph pair (module's forward semantics) ---
    pattern_embedding = jax.random.normal(k_p, (L,), jnp.float32)
    graph_embedding = jax.random.normal(k_g, (L,), jnp.float32)

    result = counter13_forward(pattern_embedding, graph_embedding,
                               W_c_13, bias_c_13)
    jax.block_until_ready(result)
    ref = _reference(pattern_embedding.reshape(1, L),
                     graph_embedding.reshape(1, L),
                     W_c_13, bias_c_13).reshape(())
    assert jnp.allclose(result, ref, rtol=1e-5, atol=1e-4), (result, ref)

    # --- Small batch (single-shot, ungridded path) ---
    Bs = 4
    p_small = jax.random.normal(k_pb, (Bs, L), jnp.float32)
    g_small = jax.random.normal(k_gb, (Bs, L), jnp.float32)
    out_small = counter13_forward_batched(p_small, g_small, W_c_13, bias_c_13)
    jax.block_until_ready(out_small)
    ref_small = _reference(p_small, g_small, W_c_13, bias_c_13)
    assert jnp.allclose(out_small, ref_small, rtol=1e-5, atol=1e-4), (
        jnp.max(jnp.abs(out_small - ref_small)))

    # --- Gridded batched path (2 parallel tiles of 256, batch padded 384->512) ---
    B = 384
    pattern_batch = jax.random.normal(k_pb, (B, L), jnp.float32)
    graph_batch = jax.random.normal(k_gb, (B, L), jnp.float32)

    result_b = counter13_forward_batched(pattern_batch, graph_batch,
                                         W_c_13, bias_c_13, tile_b=512)
    jax.block_until_ready(result_b)
    ref_b = _reference(pattern_batch, graph_batch, W_c_13, bias_c_13)
    assert jnp.allclose(result_b, ref_b, rtol=1e-5, atol=1e-4), (
        jnp.max(jnp.abs(result_b - ref_b)))

    # --- Same, bf16 compute path (halves g/p/W HBM traffic), relaxed tolerance ---
    result_bf16 = counter13_forward_batched(pattern_batch, graph_batch,
                                            W_c_13, bias_c_13, tile_b=512,
                                            compute_dtype=jnp.bfloat16)
    jax.block_until_ready(result_bf16)
    assert jnp.allclose(result_bf16, ref_b, rtol=2e-2, atol=2e-1), (
        jnp.max(jnp.abs(result_bf16 - ref_b)))

    print("KERNEL_OK")
</pallas_src>

<mosaic_0001>
module attributes {stable_mosaic.version = 11 : i64} {
  func.func @counter13_kernel(%arg0: memref<2x1x128xf32, #tpu.memory_space<vmem>>, %arg1: memref<128x128xf32, #tpu.memory_space<vmem>>, %arg2: memref<1x128xf32, #tpu.memory_space<vmem>>, %arg3: memref<1x1xf32, #tpu.memory_space<vmem>>) attributes {dimension_semantics = [], scalar_prefetch = 0 : i64, scratch_operands = 0 : i64, tpu.core_type = #tpu.core_type<tc>} {
    %c0 = arith.constant 0 : index
    %c0_0 = arith.constant 0 : index
    %c0_1 = arith.constant 0 : index
    %0 = vector.load %arg0[%c0, %c0_0, %c0_1] : memref<2x1x128xf32, #tpu.memory_space<vmem>>, vector<1x1x128xf32>
    %1 = vector.shape_cast %0 : vector<1x1x128xf32> to vector<1x128xf32>
    %c1 = arith.constant 1 : index
    %c0_2 = arith.constant 0 : index
    %c0_3 = arith.constant 0 : index
    %2 = vector.load %arg0[%c1, %c0_2, %c0_3] : memref<2x1x128xf32, #tpu.memory_space<vmem>>, vector<1x1x128xf32>
    %3 = vector.shape_cast %2 : vector<1x1x128xf32> to vector<1x128xf32>
    %c0_4 = arith.constant 0 : index
    %c0_5 = arith.constant 0 : index
    %4 = vector.load %arg1[%c0_4, %c0_5] : memref<128x128xf32, #tpu.memory_space<vmem>>, vector<128x128xf32>
    %cst = arith.constant dense<0.000000e+00> : vector<1x128xf32>
    %5 = tpu.matmul %1, %4, %cst {dimension_numbers = #tpu.dot_dimension_numbers<[1], [0], [0], [1], [0, 0, 1, 1], [], []>} : vector<1x128xf32>, vector<128x128xf32>, vector<1x128xf32> -> vector<1x128xf32>
    %c0_6 = arith.constant 0 : index
    %c0_7 = arith.constant 0 : index
    %6 = vector.load %arg2[%c0_6, %c0_7] : memref<1x128xf32, #tpu.memory_space<vmem>>, vector<1x128xf32>
    %7 = arith.addf %5, %6 : vector<1x128xf32>
    %cst_8 = arith.constant 0.000000e+00 : f32
    %8 = vector.broadcast %cst_8 : f32 to vector<1x128xf32>
    %9 = arith.maximumf %7, %8 : vector<1x128xf32>
    %10 = arith.mulf %9, %3 : vector<1x128xf32>
    %cst_9 = arith.constant dense<0.000000e+00> : vector<1xf32>
    %11 = vector.multi_reduction <add>, %10, %cst_9 [1] : vector<1x128xf32> to vector<1xf32>
    %12 = vector.shape_cast %11 : vector<1xf32> to vector<1x1xf32>
    %cst_10 = arith.constant 0.000000e+00 : f32
    %13 = vector.broadcast %cst_10 : f32 to vector<1x1xf32>
    %14 = arith.maximumf %12, %13 : vector<1x1xf32>
    %c0_11 = arith.constant 0 : index
    %c0_12 = arith.constant 0 : index
    %15 = vector.load %arg3[%c0_11, %c0_12] : memref<1x1xf32, #tpu.memory_space<vmem>>, vector<1x1xf32>
    tpu.vector_store %arg3[%c0_11, %c0_12], %14 {strides = array<i32>} : memref<1x1xf32, #tpu.memory_space<vmem>>, vector<1x1xf32>,
    return
  }
}

</mosaic_0001>

<bundles_post_ra>
// kernel: tpu_custom_call.1
= control target key start
LH: loop header
LB: loop body
LE: loop exit
PB: predicated region body
PF: predicated region fallthrough
CT: control target
= control target key end

     0   :  { %8 = vsyncpa [#allocation3], 0  ;;  %s385_s0 = inlined_call_operand.hbm [shape: f32[2,1,128], index: 0, kind: input, shape index: {}]   ;;  %s386_s1 = inlined_call_operand.hbm [shape: f32[128,128], index: 1, kind: input, shape index: {}]   ;;  %s387_s2 = inlined_call_operand.vmem [shape: f32[1,128], index: 2, kind: input, shape index: {}]   ;;  %s388_s3 = inlined_call_operand.hbm [shape: f32[1,1], index: 3, kind: output, shape index: {}]  }
   0x1   :  { %9 = vsyncpa [#allocation6], 0 }
   0x2   :  { %10 = vsyncpa [#allocation4], 0  ;;  %s316_s12 = smov [#allocation2]   ;;  %s244_s16 = scalar_lea.hbm %s385_s0, 32 }
   0x3   :  { %s16_s13 = sshll.u32 %s316_s12, 4  ;;  %p245_p0 = scmp.ne.s32.totalorder %s385_s0, %s244_s16  ;;  %s17_s13 = int_to_ptr.vmem [resolvable:$true] %s16_s13 }
   0x4   :  { %p248_p1 = scmp.lt.u32.totalorder %s244_s16, %s385_s0 }
   0x6   :  { %p250_p2 = pnand %p248_p1, %p245_p0 }
   0x8   :  { %253 = shalt.err (!%p250_p2)
}
   0x9   :  { %s254_s21 = scalar_lea.vmem %s17_s13, 32  ;;  %p259_p4 = scmp.lt.s32.totalorder %s17_s13, %s17_s13 }
   0xa   :  { %p255_p3 = scmp.ne.s32.totalorder %s17_s13, %s254_s21  ;;  %p260_p5 = scmp.lt.s32.totalorder %s254_s21, %s254_s21 }
   0xc   :  { %p261_p6 = por %p260_p5, %p259_p4 }
   0xe   :  { %p262_p7 = pnand %p261_p6, %p255_p3 }
  0x10   :  { %265 = shalt.err (!%p262_p7)
}
  0x11   :  { %s317_s22 = smov 16   ;;  %s318_s23 = smov 1  }
  0x12   :  { %22 = dma.hbm_to_vmem [thread:$0]  %s385_s0, 32, %s17_s13, [#allocation3], %s317_s22, %s317_s22, %s318_s23  }
  0x13   :  { %s319_s26 = smov [#allocation5]   ;;  %s266_s30 = scalar_lea.hbm %s386_s1, 2048 }
  0x14   :  { %s28_s27 = sshll.u32 %s319_s26, 4  ;;  %p267_p8 = scmp.ne.s32.totalorder %s386_s1, %s266_s30  ;;  %s29_s27 = int_to_ptr.vmem [resolvable:$true] %s28_s27 }
  0x15   :  { %p270_p9 = scmp.lt.u32.totalorder %s266_s30, %s386_s1 }
  0x17   :  { %p272_p10 = pnand %p270_p9, %p267_p8 }
  0x19   :  { %275 = shalt.err (!%p272_p10)
}
  0x1a   :  { %s276_s8 = scalar_lea.vmem %s29_s27, 2048  ;;  %p281_p12 = scmp.lt.s32.totalorder %s29_s27, %s29_s27 }
  0x1b   :  { %p277_p11 = scmp.ne.s32.totalorder %s29_s27, %s276_s8  ;;  %p282_p13 = scmp.lt.s32.totalorder %s276_s8, %s276_s8 }
  0x1d   :  { %p283_p0 = por %p282_p13, %p281_p12 }
  0x1f   :  { %p284_p1 = pnand %p283_p0, %p277_p11 }
  0x21   :  { %287 = shalt.err (!%p284_p1)
}
  0x22   :  { %s320_s0 = smov 128   ;;  %s321_s9 = smov 8  }
  0x23   :  { %34 = dma.hbm_to_vmem [thread:$0]  %s386_s1, 2048, %s29_s27, [#allocation6], %s320_s0, %s320_s0, %s321_s9  }
  0x24   :  { %310 = dma.done.wait [#allocation3], 32  }
  0x25   :  { %311 = vsyncadd [#allocation3], 4294967264 }
  0x26   :  { %312 = dma.done.wait [#allocation6], 2048  }
  0x27   :  { %313 = vsyncadd [#allocation6], 4294965248  ;;  %v322_v0 = vmov 0.0|0.0   ;;  %vm323_vm0 = vmmov 0   ;;  %v324_v1 = vmov 0.0   ;;  %v46_v2 = vld [vmem:[#allocation5] sm:$0xff] }
  0x28   :  { %210 = vmatprep.subr.bf16.mxu0 %v322_v0  ;;  %207 = vmatprep.mubr.msk.f32.mxu0 %vm323_vm0, %v324_v1  ;;  %v47_v3 = vld [vmem:[#allocation5 + $0x8] sm:$0xff]  ;;  %v48_v4 = vld [vmem:[#allocation5 + $0x10] sm:$0xff]  ;;  %v49_v6 = vld [vmem:[#allocation5 + $0x18] sm:$0xff]  ;;  %vm135_vm1 = vcmask 1040384   ;;  %s325_s13 = smov [#allocation7]   ;;  %vm140_vm2 = vcmask 0  }
  0x29   :  { %v211_v5 = vpack.c.bf16 %v47_v3, %v46_v2  ;;  %v214_v7 = vpack.c.bf16 %v49_v6, %v48_v4  ;;  %v50_v8 = vld [vmem:[#allocation5 + $0x20] sm:$0xff]  ;;  %v51_v9 = vld [vmem:[#allocation5 + $0x28] sm:$0xff]  ;;  %v52_v11 = vld [vmem:[#allocation5 + $0x30] sm:$0xff]  ;;  %s148_s14 = sshll.u32 %s325_s13, 4  ;;  %s149_s14 = int_to_ptr.vmem [resolvable:$true] %s148_s14 }
  0x2a   :  { %v217_v10 = vpack.c.bf16 %v51_v9, %v50_v8  ;;  %v53_v12 = vld [vmem:[#allocation5 + $0x38] sm:$0xff]  ;;  %v54_v14 = vld [vmem:[#allocation5 + $0x40] sm:$0xff]  ;;  %v55_v15 = vld [vmem:[#allocation5 + $0x48] sm:$0xff]  ;;  %s288_s15 = scalar_lea.vmem %s149_s14, 16  ;;  %s292_s16 = scalar_lea.vmem %s149_s14, 32 }
  0x2b   :  { %212 = vmatpush3.bf16.msra.mxu0 %v211_v5  ;;  %v220_v13 = vpack.c.bf16 %v53_v12, %v52_v11  ;;  %v223_v16 = vpack.c.bf16 %v55_v15, %v54_v14  ;;  %v56_v17 = vld [vmem:[#allocation5 + $0x50] sm:$0xff]  ;;  %v57_v18 = vld [vmem:[#allocation5 + $0x58] sm:$0xff]  ;;  %v58_v20 = vld [vmem:[#allocation5 + $0x60] sm:$0xff]  ;;  %p289_p2 = scmp.ne.s32.totalorder %s149_s14, %s288_s15  ;;  %p293_p3 = scmp.lt.s32.totalorder %s149_s14, %s149_s14 }
  0x2c   :  { %213 = vmatprep.subr.bf16.mxu0 %v322_v0  ;;  %v226_v19 = vpack.c.bf16 %v57_v18, %v56_v17  ;;  %v59_v21 = vld [vmem:[#allocation5 + $0x68] sm:$0xff]  ;;  %v60_v23 = vld [vmem:[#allocation5 + $0x70] sm:$0xff]  ;;  %v61_v24 = vld [vmem:[#allocation5 + $0x78] sm:$0xff]  ;;  %p294_p4 = scmp.lt.s32.totalorder %s292_s16, %s288_s15 }
  0x2d   :  { %v229_v22 = vpack.c.bf16 %v59_v21, %v58_v20  ;;  %v232_v25 = vpack.c.bf16 %v61_v24, %v60_v23  ;;  %v43_v26 = vld [vmem:[#allocation2] sm:$0x1]  ;;  %v45_v31 = vld [vmem:[#allocation2 + $0x1] sm:$0x1] }
  0x2e   :  { %v62_v27 = vld [vmem:[%s387_s2] sm:$0x1]  ;;  %p295_p5 = por %p294_p4, %p293_p3 }
  0x2f   :  { %215 = vmatpush3.bf16.msra.mxu0 %v214_v7 }
  0x30   :  { %216 = vmatprep.subr.bf16.mxu0 %v322_v0  ;;  %p296_p6 = pnand %p295_p5, %p289_p2 }
  0x33   :  { %218 = vmatpush3.bf16.msra.mxu0 %v217_v10 }
  0x34   :  { %219 = vmatprep.subr.bf16.mxu0 %v322_v0 }
  0x37   :  { %221 = vmatpush3.bf16.msra.mxu0 %v220_v13 }
  0x38   :  { %222 = vmatprep.subr.bf16.mxu0 %v322_v0 }
  0x3b   :  { %224 = vmatpush3.bf16.msra.mxu0 %v223_v16 }
  0x3c   :  { %225 = vmatprep.subr.bf16.mxu0 %v322_v0 }
  0x3f   :  { %227 = vmatpush3.bf16.msra.mxu0 %v226_v19 }
  0x40   :  { %228 = vmatprep.subr.bf16.mxu0 %v322_v0 }
  0x43   :  { %230 = vmatpush3.bf16.msra.mxu0 %v229_v22 }
  0x44   :  { %231 = vmatprep.subr.bf16.mxu0 %v322_v0 }
  0x47   :  { %233 = vmatpush3.bf16.msra.mxu0 %v232_v25 }
  0x4a   :  { %208 = vmatmul.mubr.f32.vlgmr.msra.gmra.mrb[0].mxu0 %v43_v26 }
 0x11d   :  { %v129_v28 = vpop.f32.mrb[0].mxu0 }
 0x11e   :  { %v130_v29 = vadd.f32 %v129_v28, %v62_v27  ;;  %v209_v30 = vpop.f32.mrb[1].mxu0 }
 0x120   :  { %v133_v32 = vmax.f32 %v130_v29, 0.0 }
 0x122   :  { %v134_v33 = vmul.f32 %v133_v32, %v45_v31 }
 0x124   :  { %v136_v34 = vsel %vm135_vm1, %v134_v33, 0.0 }
 0x125   :  { %137 = vadd.xlane.f32.xlu0 %v136_v34 }
 0x1b2   :  { %v138_v35 = vpop.xlane.xlu0 %137 }
 0x1b3   :  { %v139_v36 = vmax.f32 %v138_v35, 0.0 }
 0x1b5   :  { %141 = vst.msk [vmem:[#allocation7] sm:$0x1] %vm140_vm2, %v139_v36 }
 0x1b6   :  { %299 = shalt.err (!%p296_p6)
}
 0x1b7   :  { %s300_s18 = scalar_lea.hbm %s388_s3, 16 }
 0x1b8   :  { %p301_p7 = scmp.ne.s32.totalorder %s388_s3, %s300_s18  ;;  %p304_p8 = scmp.lt.u32.totalorder %s300_s18, %s388_s3 }
 0x1ba   :  { %p306_p9 = pnand %p304_p8, %p301_p7 }
 0x1bc   :  { %309 = shalt.err (!%p306_p9)
}
 0x1bd   :  { %151 = dma.vmem_to_hbm [thread:$0]  %s149_s14, 16, %s388_s3, [#allocation4]  }
 0x1be   :  { %314 = dma.done.wait [#allocation4], 16  }
 0x1bf   :  { %315 = vsyncadd [#allocation4], 4294967280 }
 0x1c0   :  { %155 = vsyncpa [#allocation3], 1 }
 0x1c1   :  { %156 = vsyncpa [#allocation6], 1 }
 0x1c2   :  { %157 = vsyncpa [#allocation4], 1 }

</bundles_post_ra>
